<compile_context>
chip_gen: v6e
topology: v6e:2x2x1
jax: 0.10.0
libtpu: 0.0.40
codegen_flags: <defaults>
</compile_context>

<pallas_src>
import functools
import math

import jax
import jax.numpy as jnp
from jax.experimental import pallas as pl
from jax.experimental.pallas import tpu as pltpu


def _pe_kernel(*refs, tile_s: int, cache_pe: bool, has_mask: bool):
    # refs: x (+ mask) blocks of shape (bT, tS, D), output block, PE scratch (tS, D).
    if has_mask:
        x_ref, m_ref, o_ref, pe_ref = refs
    else:
        x_ref, o_ref, pe_ref = refs
    _, TS, D = x_ref.shape
    s = pl.program_id(0)   # S-tile index (outer, "parallel")
    b = pl.program_id(1)   # batch-tile index (inner)

    def build_pe():
        col = jax.lax.broadcasted_iota(jnp.int32, (1, D), 1)                    # (1, D)
        j = (col >> 1).astype(jnp.float32)                                      # pair index
        # 1 / 10000^(2j/D) == exp(-(2j/D) * ln 1e4)  -> only D transcendentals.
        inv_freq = jnp.exp(j * jnp.float32(-2.0 / float(D) * math.log(10000.0)))
        # Odd columns get a +pi/2 phase: sin(a + pi/2) == cos(a).
        phase = (col & 1).astype(jnp.float32) * jnp.float32(math.pi / 2.0)
        # Positions in int32 (no f32 iota drift for long S), offset by the S-tile start.
        pos = (jax.lax.broadcasted_iota(jnp.int32, (TS, D), 0) + s * tile_s
               ).astype(jnp.float32)
        pe_ref[...] = jnp.sin(pos * inv_freq + phase).astype(pe_ref.dtype)

    if cache_pe:
        # Valid only because the batch axis is the innermost, sequential ("arbitrary")
        # grid axis: for every S-tile, b == 0 runs before all b > 0 reuse steps.
        @pl.when(b == 0)
        def _():
            build_pe()
    else:
        build_pe()

    pe = pe_ref[...].astype(x_ref.dtype)             # bf16 stays bf16; f32 stays f32
    y = x_ref[...] + pe[None]                        # broadcast over folded batch dim
    if has_mask:
        y = y * m_ref[...]                           # mask already scaled by 1/(1-p)
    o_ref[...] = y.astype(o_ref.dtype)


def _choose_tiles(B: int, S: int, D: int, itemsize: int, n_streams: int):
    """Pick (tile_s, tile_b): ~2 MiB per streamed buffer per step, VMEM-budgeted."""
    target = 2 * 1024 * 1024                       # bytes per in/out buffer per step
    budget = 24 * 1024 * 1024                      # total pipelined-buffer budget
    row_bytes = max(1, D * itemsize)

    if S <= 8:
        ts = S                                     # full-extent block if S < 8
    else:
        ts = max(8, ((target // row_bytes) // 8) * 8)
        if ts >= S:
            ts = S
    # Fold batch rows into the block when a full-S tile is still small (small D / S).
    bt = 1
    if ts == S:
        for cand in range(B, 0, -1):
            if B % cand == 0 and cand * ts * row_bytes <= 2 * target:
                bt = cand
                break

    def fits(ts_, bt_):
        block = bt_ * ts_ * row_bytes
        pe = ts_ * D * 4
        temps = 2 * bt_ * ts_ * D * 4              # elementwise temporaries headroom
        return 2 * n_streams * block + pe + temps <= budget

    while not fits(ts, bt) and bt > 1:             # shrink the batch fold first
        for cand in range(bt - 1, 0, -1):
            if B % cand == 0:
                bt = cand
                break
    while not fits(ts, bt) and ts > 8:             # then halve the S tile
        ts = max(8, ((ts // 2) // 8) * 8)
    return ts, bt


def absolute_sinusoidal_positional_encoding(
    x: jax.Array, *, dropout_p: float = 0.0, training: bool = False,
    key: jax.Array | None = None, tile_s: int | None = None, tile_b: int | None = None,
) -> jax.Array:
    """x: (B, S, D). Returns dropout(x + sinusoidal_pe), matching the PyTorch module."""
    B, S, D = x.shape
    has_mask = bool(training) and float(dropout_p) > 0.0
    n_streams = 3 if has_mask else 2               # x (+ mask) + output

    ts_auto, bt_auto = _choose_tiles(B, S, D, x.dtype.itemsize, n_streams)
    ts = ts_auto if tile_s is None else int(tile_s)
    bt = bt_auto if tile_b is None else int(tile_b)
    assert B % bt == 0, "tile_b must divide the batch size"
    num_s = pl.cdiv(S, ts)
    num_b = B // bt

    # PE scratch / compute dtype: bf16 stays bf16 (v6e/v7x VPU), everything else f32.
    pe_dtype = x.dtype if x.dtype == jnp.bfloat16 else jnp.float32
    pe_itemsize = jnp.dtype(pe_dtype).itemsize

    # Cache PE across the batch only when there is something to amortize AND the
    # S-tile axis alone can feed both v7x TensorCores; otherwise rebuild per step and
    # keep every grid axis parallel.
    cache_pe = (num_b > 1) and (num_s > 1)
    batch_sem = "arbitrary" if cache_pe else "parallel"

    # Explicit scoped-VMEM limit covering double-buffered streams + scratch + temps.
    block_bytes = bt * ts * D * x.dtype.itemsize
    footprint = (2 * n_streams * block_bytes          # double-buffered in/out streams
                 + ts * D * pe_itemsize               # PE scratch
                 + 2 * bt * ts * D * 4)               # elementwise temporaries
    vmem_limit = int(min(48 << 20, max(16 << 20, footprint + (4 << 20))))

    spec = pl.BlockSpec((bt, ts, D), lambda s, b: (b, s, 0))
    inputs = [x]
    in_specs = [spec]
    if has_mask:
        if key is None:
            key = jax.random.PRNGKey(0)
        keep = jax.random.bernoulli(key, 1.0 - float(dropout_p), (B, S, D))
        scale = jnp.asarray(1.0 / (1.0 - float(dropout_p)), dtype=x.dtype)
        inputs.append(keep.astype(x.dtype) * scale)   # pre-scaled keep mask
        in_specs.append(spec)

    kernel = functools.partial(
        _pe_kernel, tile_s=ts, cache_pe=cache_pe, has_mask=has_mask)

    return pl.pallas_call(
        kernel,
        out_shape=jax.ShapeDtypeStruct((B, S, D), x.dtype),
        grid_spec=pltpu.PrefetchScalarGridSpec(
            num_scalar_prefetch=0,
            grid=(num_s, num_b),                        # S tiles outer, batch inner
            in_specs=in_specs,
            out_specs=spec,
            scratch_shapes=[pltpu.VMEM((ts, D), pe_dtype)],   # cached PE tile
        ),
        compiler_params=pltpu.CompilerParams(
            dimension_semantics=("parallel", batch_sem),
            vmem_limit_bytes=vmem_limit,
        ),
    )(*inputs)


def _reference_pe(S: int, D: int) -> jnp.ndarray:
    # Direct transcription of the PyTorch double loop.
    rows = []
    for i in range(S):
        row = [0.0] * D
        for j in range(D // 2):
            ang = i / math.pow(10000.0, 2 * j / D)
            row[2 * j] = math.sin(ang)
            row[2 * j + 1] = math.cos(ang)
        rows.append(row)
    return jnp.asarray(rows, dtype=jnp.float32)


if __name__ == "__main__":
    key = jax.random.PRNGKey(0)

    # --- Case 1: small canonical shape, eval mode (dropout is identity). ---
    B, S, D = 2, 8, 32
    x = jax.random.normal(key, (B, S, D), dtype=jnp.float32)
    y = absolute_sinusoidal_positional_encoding(x, dropout_p=0.1, training=False)
    y = jax.block_until_ready(y)
    y_ref = x + _reference_pe(S, D)[None]
    assert y.shape == (B, S, D)
    assert jnp.allclose(y, y_ref, atol=1e-5), "mismatch vs reference (case 1)"

    # --- Case 2: multiple S tiles (tile_s=8 over S=16) to exercise the tile offset
    #             and the cross-batch PE scratch caching path. ---
    B2, S2, D2 = 2, 16, 128
    x2 = jax.random.normal(jax.random.PRNGKey(1), (B2, S2, D2), dtype=jnp.float32)
    y2 = absolute_sinusoidal_positional_encoding(
        x2, dropout_p=0.0, training=False, tile_s=8, tile_b=1)
    y2 = jax.block_until_ready(y2)
    y2_ref = x2 + _reference_pe(S2, D2)[None]
    assert jnp.allclose(y2, y2_ref, atol=1e-5), "mismatch vs reference (case 2)"

    # --- Case 3: train-mode dropout path (host-generated mask, fused scale/select). ---
    y_tr = absolute_sinusoidal_positional_encoding(
        x, dropout_p=0.5, training=True, key=jax.random.PRNGKey(123))
    y_tr = jax.block_until_ready(y_tr)
    zero_frac = float(jnp.mean((y_tr == 0.0).astype(jnp.float32)))
    assert 0.2 < zero_frac < 0.8, f"dropout zero fraction implausible: {zero_frac}"
    # kept elements are scaled by 1/(1-p) = 2
    kept = y_tr != 0.0
    assert jnp.allclose(jnp.where(kept, y_tr, 2.0 * y_ref), 2.0 * y_ref, atol=1e-4)

    print("KERNEL_OK")
</pallas_src>

<mosaic_0001>
module attributes {stable_mosaic.version = 11 : i64} {
  func.func @_pe_kernel(%arg0: i32, %arg1: i32, %arg2: memref<2x8x32xf32, #tpu.memory_space<vmem>>, %arg3: memref<2x8x32xf32, #tpu.memory_space<vmem>>, %arg4: memref<8x32xf32, #tpu.memory_space<vmem>>) attributes {dimension_semantics = [#tpu.dimension_semantics<parallel>, #tpu.dimension_semantics<parallel>], iteration_bounds = array<i64: 1, 1>, scalar_prefetch = 0 : i64, scratch_operands = 1 : i64, tpu.core_type = #tpu.core_type<tc>, window_params = [{transform_indices = @transform_0, window_bounds = array<i64: 2, 8, 32>}, {transform_indices = @transform_1, window_bounds = array<i64: 2, 8, 32>}]} {
    %0 = tpu.iota {dimensions = array<i32: 1>} : vector<1x32xi32>
    %c1_i32 = arith.constant 1 : i32
    %1 = vector.broadcast %c1_i32 : i32 to vector<1x32xi32>
    %2 = arith.shrsi %0, %1 : vector<1x32xi32>
    %3 = arith.sitofp %2 : vector<1x32xi32> to vector<1x32xf32>
    %cst = arith.constant -0.575646281 : f32
    %4 = vector.broadcast %cst : f32 to vector<1x32xf32>
    %5 = arith.mulf %3, %4 : vector<1x32xf32>
    %6 = math.exp %5 : vector<1x32xf32>
    %c1_i32_0 = arith.constant 1 : i32
    %7 = vector.broadcast %c1_i32_0 : i32 to vector<1x32xi32>
    %8 = arith.andi %0, %7 : vector<1x32xi32>
    %9 = arith.sitofp %8 : vector<1x32xi32> to vector<1x32xf32>
    %cst_1 = arith.constant 1.57079637 : f32
    %10 = vector.broadcast %cst_1 : f32 to vector<1x32xf32>
    %11 = arith.mulf %9, %10 : vector<1x32xf32>
    %12 = tpu.iota {dimensions = array<i32: 0>} : vector<8x32xi32>
    %c8_i32 = arith.constant 8 : i32
    %13 = arith.muli %arg0, %c8_i32 : i32
    %14 = vector.broadcast %13 : i32 to vector<8x32xi32>
    %15 = arith.addi %12, %14 : vector<8x32xi32>
    %16 = arith.sitofp %15 : vector<8x32xi32> to vector<8x32xf32>
    %17 = vector.broadcast %6 : vector<1x32xf32> to vector<8x32xf32>
    %18 = arith.mulf %16, %17 : vector<8x32xf32>
    %19 = vector.broadcast %11 : vector<1x32xf32> to vector<8x32xf32>
    %20 = arith.addf %18, %19 : vector<8x32xf32>
    %21 = math.sin %20 : vector<8x32xf32>
    %c0 = arith.constant 0 : index
    %c0_2 = arith.constant 0 : index
    %22 = vector.load %arg4[%c0, %c0_2] : memref<8x32xf32, #tpu.memory_space<vmem>>, vector<8x32xf32>
    tpu.vector_store %arg4[%c0, %c0_2], %21 {strides = array<i32>} : memref<8x32xf32, #tpu.memory_space<vmem>>, vector<8x32xf32>,
    %c0_3 = arith.constant 0 : index
    %c0_4 = arith.constant 0 : index
    %23 = vector.load %arg4[%c0_3, %c0_4] : memref<8x32xf32, #tpu.memory_space<vmem>>, vector<8x32xf32>
    %c0_5 = arith.constant 0 : index
    %c0_6 = arith.constant 0 : index
    %c0_7 = arith.constant 0 : index
    %24 = vector.load %arg2[%c0_5, %c0_6, %c0_7] : memref<2x8x32xf32, #tpu.memory_space<vmem>>, vector<2x8x32xf32>
    %25 = vector.shape_cast %23 : vector<8x32xf32> to vector<1x8x32xf32>
    %26 = vector.broadcast %25 : vector<1x8x32xf32> to vector<2x8x32xf32>
    %27 = arith.addf %24, %26 : vector<2x8x32xf32>
    %c0_8 = arith.constant 0 : index
    %c0_9 = arith.constant 0 : index
    %c0_10 = arith.constant 0 : index
    %28 = vector.load %arg3[%c0_8, %c0_9, %c0_10] : memref<2x8x32xf32, #tpu.memory_space<vmem>>, vector<2x8x32xf32>
    tpu.vector_store %arg3[%c0_8, %c0_9, %c0_10], %27 {strides = array<i32>} : memref<2x8x32xf32, #tpu.memory_space<vmem>>, vector<2x8x32xf32>,
    return
  }
  func.func @transform_0(%arg0: i32, %arg1: i32) -> (i32, i32, i32) {
    %c0_i32 = arith.constant 0 : i32
    %c0_i32_0 = arith.constant 0 : i32
    return %arg1, %arg0, %c0_i32 : i32, i32, i32
  }
  func.func @transform_1(%arg0: i32, %arg1: i32) -> (i32, i32, i32) {
    %c0_i32 = arith.constant 0 : i32
    %c0_i32_0 = arith.constant 0 : i32
    return %arg1, %arg0, %c0_i32 : i32, i32, i32
  }
}

</mosaic_0001>

<bundles_post_ra>
// kernel: tpu_custom_call.1
= control target key start
LH: loop header
LB: loop body
LE: loop exit
PB: predicated region body
PF: predicated region fallthrough
CT: control target
= control target key end

     0   :  { %6 = vsyncpa [#allocation4], 0  ;;  %s292_s0 = inlined_call_operand.hbm [shape: f32[2,8,32], index: 0, kind: input, shape index: {}]   ;;  %s293_s1 = inlined_call_operand.hbm [shape: f32[2,8,32], index: 1, kind: output, shape index: {}]  }
   0x1   :  { %7 = vsyncpa [#allocation5], 0  ;;  %s239_s6 = smov [#allocation3]  }
   0x2   :  { %s13_s7 = sshll.u32 %s239_s6, 4  ;;  %s14_s7 = int_to_ptr.vmem [resolvable:$true] %s13_s7 }
   0x3   :  { %s203_s8 = scalar_lea.vmem %s14_s7, 256  ;;  %p208_p1 = scmp.lt.s32.totalorder %s14_s7, %s14_s7 }
   0x4   :  { %p204_p0 = scmp.ne.s32.totalorder %s14_s7, %s203_s8  ;;  %p209_p2 = scmp.lt.s32.totalorder %s203_s8, %s203_s8 }
   0x6   :  { %p210_p3 = por %p209_p2, %p208_p1 }
   0x8   :  { %p211_p4 = pnand %p210_p3, %p204_p0 }
   0xa   :  { %214 = shalt.err (!%p211_p4)
}
   0xb   :  { %s240_s9 = smov 128   ;;  %s241_s10 = smov 8  }
   0xc   :  { %19 = dma.hbm_to_vmem [thread:$0]  %s292_s0, 256, %s14_s7, [#allocation4], %s240_s9, %s240_s9, %s241_s10  }
   0xd   :  { %235 = dma.done.wait [#allocation4], 256  }
   0xe   :  { %236 = vsyncadd [#allocation4], 4294967040  ;;  %v23_v0 = vlaneseq  ;;  %v242_v25 = vmov 683565275   ;;  %v243_v27 = vmov 2475754826  }
   0xf   :  { %v244_v29 = vmov 2131351028   ;;  %v245_v31 = vmov 2102212464   ;;  %v246_v33 = vmov 920167782  }
  0x10   :  { %v24_v1 = vand.u32 127, %v23_v0  ;;  %v34_v7 = vshrl.u32 %v23_v0, 7  ;;  %v247_v40 = vmov 1326507024   ;;  %vm145_vm13 = vcmask 261120   ;;  %s248_s0 = smov [#allocation6]  }
  0x11   :  { %s159_s13 = sshll.u32 %s248_s0, 4  ;;  %s160_s13 = int_to_ptr.vmem [resolvable:$true] %s159_s13 }
  0x12   :  { %v25_v2 = vshra.s32 %v24_v1, 1  ;;  %v30_v6 = vand.u32 1, %v24_v1  ;;  %v38_v9 = vcvt.s32.f32 %v34_v7  ;;  %s215_s14 = scalar_lea.vmem %s160_s13, 256  ;;  %p220_p6 = scmp.lt.s32.totalorder %s160_s13, %s160_s13 }
  0x13   :  { %p216_p5 = scmp.ne.s32.totalorder %s160_s13, %s215_s14  ;;  %p221_p7 = scmp.lt.s32.totalorder %s215_s14, %s215_s14 }
  0x14   :  { %v26_v3 = vcvt.s32.f32 %v25_v2  ;;  %v31_v8 = vcvt.s32.f32 %v30_v6 }
  0x15   :  { %p222_p8 = por %p221_p7, %p220_p6 }
  0x16   :  { %v27_v4 = vmul.f32 -0.5756463, %v26_v3  ;;  %v32_v10 = vmul.f32 1.5707964, %v31_v8 }
  0x17   :  { %p223_p9 = pnand %p222_p8, %p216_p5 }
  0x18   :  { %v28_v5 = vmul.f32 1.442695, %v27_v4 }
  0x1a   :  { %189 = vpow2.f32 %v28_v5 }
  0x27   :  { %v190_v11 = vpop.eup %189 }
  0x28   :  { %v39_v12 = vmul.f32 %v190_v11, %v38_v9 }
  0x2a   :  { %v265_v13 = vadd.f32 %v39_v12, %v32_v10 }
  0x2c   :  { %v44_v14 = vand.u32 2139095040, %v265_v13  ;;  %v41_v16 = vand.u32 2147483647, %v265_v13  ;;  %vm43_vm7 = vcmp.lt.s32.totalorder %v265_v13, 0  ;;  %vm133_vm12 = vweird.f32 %v265_v13 }
  0x2e   :  { %v45_v15 = vshrl.u32 %v44_v14, 23  ;;  %v48_v19 = vand.u32 8388607, %v41_v16  ;;  %vm42_vm8 = vcmp.le.f32.partialorder %v41_v16, 0.7853982 }
  0x30   :  { %v171_v17 = vadd.s32 4294967169, %v45_v15  ;;  %v49_v22 = vor.u32 8388608, %v48_v19 }
  0x32   :  { %v51_v18 = vadd.s32 1, %v171_v17  ;;  %v89_v42 = vshll.u32 %v49_v22, 8 }
  0x34   :  { %vm52_vm0 = vcmp.gt.s32.totalorder %v51_v18, 0 }
  0x35   :  { %v53_v20 = vsel %vm52_vm0, %v51_v18, 0 }
  0x36   :  { %v55_v21 = vand.u32 31, %v53_v20  ;;  %v54_v23 = vshrl.u32 %v53_v20, 5 }
  0x38   :  { %v56_v24 = vsub.s32 32, %v55_v21  ;;  %v58_v26 = vshll.u32 %v242_v25, %v55_v21  ;;  %v61_v28 = vshll.u32 %v243_v27, %v55_v21  ;;  %v64_v30 = vshll.u32 %v244_v29, %v55_v21 }
  0x39   :  { %v67_v32 = vshll.u32 %v245_v31, %v55_v21  ;;  %v70_v34 = vshll.u32 %v246_v33, %v55_v21  ;;  %vm73_vm1 = vcmp.lt.s32.totalorder %v54_v23, 1  ;;  %vm76_vm2 = vcmp.lt.s32.totalorder %v54_v23, 4 }
  0x3a   :  { %v57_v35 = vshrl.u32 %v242_v25, %v56_v24  ;;  %v59_v36 = vshrl.u32 %v243_v27, %v56_v24  ;;  %v62_v37 = vshrl.u32 %v244_v29, %v56_v24  ;;  %v65_v38 = vshrl.u32 %v245_v31, %v56_v24 }
  0x3b   :  { %v68_v39 = vshrl.u32 %v246_v33, %v56_v24  ;;  %v71_v41 = vshrl.u32 %v247_v40, %v56_v24  ;;  %vm74_vm3 = vcmp.lt.s32.totalorder %v54_v23, 2  ;;  %vm75_vm4 = vcmp.lt.s32.totalorder %v54_v23, 3 }
  0x3c   :  { %v60_v43 = vor.u32 %v59_v36, %v58_v26  ;;  %v63_v44 = vor.u32 %v62_v37, %v61_v28  ;;  %v66_v45 = vor.u32 %v65_v38, %v64_v30 }
  0x3d   :  { %v69_v46 = vor.u32 %v68_v39, %v67_v32  ;;  %v72_v47 = vor.u32 %v71_v41, %v70_v34 }
  0x3e   :  { %v77_v48 = vsel %vm73_vm1, %v57_v35, %v60_v43  ;;  %v78_v49 = vsel %vm76_vm2, %v66_v45, 2102212464  ;;  %v81_v50 = vsel %vm73_vm1, %v60_v43, %v63_v44  ;;  %v85_v51 = vsel %vm73_vm1, %v63_v44, %v66_v45  ;;  %v149_v43 = vld [vmem:[#allocation3 + $0x8] sm:$0xff] }
  0x3f   :  { %v79_v52 = vsel %vm75_vm4, %v63_v44, %v78_v49  ;;  %v82_v53 = vsel %vm76_vm2, %v69_v46, 920167782  ;;  %v86_v54 = vsel %vm76_vm2, %v72_v47, 1326507024 }
  0x40   :  { %v83_v55 = vsel %vm75_vm4, %v66_v45, %v82_v53  ;;  %v87_v56 = vsel %vm75_vm4, %v69_v46, %v86_v54  ;;  %v80_v57 = vsel %vm74_vm3, %v77_v48, %v79_v52 }
  0x41   :  { %v84_v58 = vsel %vm74_vm3, %v81_v50, %v83_v55  ;;  %v88_v59 = vsel %vm74_vm3, %v85_v51, %v87_v56  ;;  %v96_v0 = vmul.u32 %v89_v42, %v80_v57 }
  0x42   :  { %v271_v60 = vmul.u32.u64.low %v89_v42, %v88_v59  ;;  %v272_v61 = vmul.u32.u64.high %v89_v42, %v88_v59, %v271_v60  ;;  %v274_v62 = vmul.u32.u64.low %v89_v42, %v84_v58  ;;  %v275_v63 = vmul.u32.u64.high %v89_v42, %v84_v58, %v274_v62  ;;  %v148_v42 = vld [vmem:[#allocation3] sm:$0xff] }
  0x44   :  { %vm98_vm5 = vc.u32 %v272_v61, %v274_v62  ;;  %v99_v1 = vadd.s32 1, %v275_v63  ;;  %v97_v12 = vadd.s32 %v274_v62, %v272_v61 }
  0x46   :  { %v100_v2 = vsel %vm98_vm5, %v99_v1, %v275_v63 }
  0x47   :  { %v101_v3 = vadd.s32 %v100_v2, %v96_v0 }
  0x49   :  { %v102_v4 = vadd.s32 536870912, %v101_v3 }
  0x4b   :  { %v103_v5 = vshrl.u32 %v102_v4, 30 }
  0x4d   :  { %v104_v6 = vshll.u32 %v103_v5, 30  ;;  %v127_v27 = vsub.s32 4, %v103_v5 }
  0x4f   :  { %v105_v7 = vsub.s32 %v101_v3, %v104_v6  ;;  %v128_v30 = vsel %vm43_vm7, %v127_v27, %v103_v5 }
  0x50   :  { %v130_v32 = vsel %vm42_vm8, 0, %v128_v30 }
  0x51   :  { %v107_v8 = vsub.s32 0, %v105_v7  ;;  %v134_v33 = vadd.s32 3, %v130_v32 }
  0x53   :  { %v172_v9 = vmin.u32 %v107_v8, %v105_v7  ;;  %v135_v34 = vand.u32 3, %v134_v33 }
  0x55   :  { %v109_v10 = vclz %v172_v9  ;;  %vm140_vm9 = vcmp.eq.s32.totalorder %v135_v34, 2  ;;  %vm137_vm10 = vcmp.eq.s32.totalorder %v135_v34, 0  ;;  %vm136_vm11 = vcmp.lt.s32.totalorder %v135_v34, 2 }
  0x57   :  { %v173_v11 = vadd.s32 4294967294, %v109_v10 }
  0x59   :  { %vm174_vm6 = vcmp.lt.s32.totalorder %v173_v11, 0 }
  0x5a   :  { %v112_v14 = vsel %vm174_vm6, 0, %v173_v11 }
  0x5b   :  { %v113_v15 = vsub.s32 32, %v112_v14  ;;  %v114_v17 = vshll.u32 %v105_v7, %v112_v14  ;;  %v117_v18 = vsub.s32 4294967266, %v112_v14 }
  0x5d   :  { %v115_v19 = vshrl.u32 %v97_v12, %v113_v15  ;;  %v118_v20 = vadd.s32 127, %v117_v18 }
  0x5f   :  { %v116_v21 = vor.u32 %v115_v19, %v114_v17  ;;  %v119_v22 = vshll.u32 %v118_v20, 23 }
  0x61   :  { %v120_v23 = vor.u32 4788187, %v119_v22  ;;  %v123_v24 = vcvt.s32.f32 %v116_v21 }
  0x63   :  { %v121_v25 = vand.u32 2147483647, %v120_v23 }
  0x65   :  { %v124_v26 = vmul.f32 %v123_v24, %v121_v25 }
  0x67   :  { %v125_v28 = vxor.u32 2147483648, %v124_v26 }
  0x69   :  { %v126_v29 = vsel %vm43_vm7, %v125_v28, %v124_v26 }
  0x6a   :  { %v129_v31 = vsel %vm42_vm8, %v265_v13, %v126_v29 }
  0x6b   :  { %191 = vcosq.f32 %v129_v31 }
  0x6c   :  { %193 = vsinq.f32 %v129_v31 }
  0x78   :  { %v192_v35 = vpop.eup %191 }
  0x79   :  { %v194_v36 = vpop.eup %193  ;;  %v141_v37 = vxor.u32 2147483648, %v192_v35 }
  0x7a   :  { %v138_v38 = vxor.u32 2147483648, %v194_v36 }
  0x7b   :  { %v142_v16 = vsel %vm140_vm9, %v141_v37, %v194_v36 }
  0x7c   :  { %v139_v39 = vsel %vm137_vm10, %v192_v35, %v138_v38 }
  0x7d   :  { %v143_v40 = vsel %vm136_vm11, %v139_v39, %v142_v16 }
  0x7e   :  { %v144_v41 = vsel %vm133_vm12, nan, %v143_v40 }
  0x7f   :  { %146 = vst.msk [vmem:[#allocation2] sm:$0xff] %vm145_vm13, %v144_v41 }
  0x86   :  { %v147_v44 = vld [vmem:[#allocation2] sm:$0xff] }
  0x87   :  { %v150_v45 = vadd.f32 %v148_v42, %v147_v44  ;;  %v151_v46 = vadd.f32 %v149_v43, %v147_v44 }
  0x89   :  { %152 = vst.msk [vmem:[#allocation6] sm:$0xff] %vm145_vm13, %v150_v45  ;;  %153 = vst.msk [vmem:[#allocation6 + $0x8] sm:$0xff] %vm145_vm13, %v151_v46 }
  0x8a   :  { %226 = shalt.err (!%p223_p9)
}
  0x8b   :  { %165 = dma.vmem_to_hbm [thread:$0]  %s160_s13, 256, %s293_s1, [#allocation5], %s240_s9, %s240_s9, %s241_s10  }
  0x8c   :  { %237 = dma.done.wait [#allocation5], 256  }
  0x8d   :  { %238 = vsyncadd [#allocation5], 4294967040 }
  0x8e   :  { %169 = vsyncpa [#allocation4], 1 }
  0x8f   :  { %170 = vsyncpa [#allocation5], 1 }

</bundles_post_ra>
